<compile_context>
chip_gen: v6e
topology: v6e:2x2x1
jax: 0.10.0
libtpu: 0.0.40
codegen_flags: <defaults>
</compile_context>

<pallas_src>
import jax
import jax.numpy as jnp
import numpy as np
from jax.experimental import pallas as pl
from jax.experimental.pallas import tpu as pltpu


def _diffusion_mse_kernel(x_ref, eps_ref, a_ref, b_ref, add_ref, w_ref,
                          out_ref):
    """One batch tile: noise-mix, surrogate model, squared-error partial sum."""
    x = x_ref[...]        # (R, HW)   R = batch_tile * C  (sublane-dense)
    eps = eps_ref[...]    # (R, HW)

    # noised image; normalize (2x-1) folded into a_ref / add_ref:
    #   x_t' = (2*sqrt(alpha_hat)) * x + sqrt(1-alpha_hat) * eps
    x_t = a_ref[...] * x + b_ref[...] * eps

    # surrogate denoiser: block-diagonal channel mix (kron(I_tile, w)),
    # one MXU pass per tile, then the precomputed bias+temb(+folded const).
    pred = jnp.dot(w_ref[...], x_t, preferred_element_type=jnp.float32)
    pred = pred + add_ref[...]

    diff = eps - pred
    sq = diff * diff

    # single cross-sublane reduce per tile -> lane-dense (1, HW) partial row.
    out_ref[0] = jnp.sum(sq, axis=0, keepdims=True)


def gaussian_diffusion_forward(images, t, eps, alpha_hat, w, bias, temb,
                               *, batch_tile=None):
    """images: (B, C, H, W) f32 NCHW; t: (B,) int32; eps: (B, C, H, W) f32."""
    B, C, H, W = images.shape
    HW = H * W

    if batch_tile is None:
        # Demo sizes: whole batch in one step. When scaling up, pick the tile
        # so each buffered input is a few MiB but fits v7x's 64 MiB VMEM
        # (2 inputs x 2 pipeline buffers x tile + matmul operands).
        batch_tile = B
    assert B % batch_tile == 0
    num_tiles = B // batch_tile
    R = batch_tile * C                      # sublane rows per tile (8 here)

    # ---- wrapper-side glue (scalar schedule work, O(B*C)) -----------------
    x2 = images.reshape(B * C, HW).astype(jnp.float32)
    e2 = eps.reshape(B * C, HW).astype(jnp.float32)

    sa = jnp.sqrt(alpha_hat[t]).astype(jnp.float32)          # (B,)
    sb = jnp.sqrt(1.0 - alpha_hat[t]).astype(jnp.float32)    # (B,)

    # per-row coefficients; img*2-1 folded in: x_t = 2*sa*x + sb*eps - sa
    a_rows = jnp.repeat(2.0 * sa, C)[:, None]                # (B*C, 1)
    b_rows = jnp.repeat(sb, C)[:, None]                      # (B*C, 1)

    # the -sa constant is pushed through the linear surrogate into the
    # additive term:  add[b,o] = bias[o] + temb[o,b] - sa[b] * sum_c w[o,c]
    w_rowsum = jnp.sum(w.astype(jnp.float32), axis=1)        # (C,)
    add = (bias[:, 0][None, :] + temb.T
           - sa[:, None] * w_rowsum[None, :])                # (B, C)
    add_rows = add.reshape(B * C, 1).astype(jnp.float32)     # (B*C, 1)

    # block-diagonal channel-mix weight shared by every tile.
    w_big = jnp.kron(jnp.eye(batch_tile, dtype=jnp.float32),
                     w.astype(jnp.float32))                  # (R, R)

    # ---- pallas call -------------------------------------------------------
    grid_spec = pltpu.PrefetchScalarGridSpec(
        num_scalar_prefetch=0,
        grid=(num_tiles,),
        in_specs=[
            pl.BlockSpec((R, HW), lambda i: (i, 0)),         # x  (tile)
            pl.BlockSpec((R, HW), lambda i: (i, 0)),         # eps (tile)
            pl.BlockSpec((R, 1), lambda i: (i, 0)),          # a_rows
            pl.BlockSpec((R, 1), lambda i: (i, 0)),          # b_rows
            pl.BlockSpec((R, 1), lambda i: (i, 0)),          # add_rows
            pl.BlockSpec((R, R), lambda i: (0, 0)),          # w_big (shared)
        ],
        out_specs=pl.BlockSpec((1, 1, HW), lambda i: (i, 0, 0)),
    )

    partials = pl.pallas_call(
        _diffusion_mse_kernel,
        out_shape=jax.ShapeDtypeStruct((num_tiles, 1, HW), jnp.float32),
        grid_spec=grid_spec,
        compiler_params=pltpu.CompilerParams(
            dimension_semantics=("parallel",)),   # independent per-tile work
    )(x2, e2, a_rows, b_rows, add_rows, w_big)

    total = float(B * C * HW)
    return jnp.sum(partials) / total


def _reference_forward(images, t, eps, alpha_hat, w, bias, temb):
    """Pure-JAX reference implementing the original (unfolded) math."""
    B, C, H, W = images.shape
    x = images.astype(jnp.float32) * 2.0 - 1.0
    sa = jnp.sqrt(alpha_hat[t])[:, None, None, None]
    sb = jnp.sqrt(1.0 - alpha_hat[t])[:, None, None, None]
    x_t = sa * x + sb * eps
    x_t2 = x_t.reshape(B, C, H * W)
    pred = (jnp.einsum('oc,bcs->bos', w, x_t2)
            + bias[None, :, :] + temb.T[:, :, None])
    return jnp.mean((eps.reshape(B, C, H * W) - pred) ** 2)


if __name__ == "__main__":
    # --- small deterministic setup ------------------------------------------
    B, C, H, W = 2, 4, 16, 16
    noise_steps = 1000
    beta_start, beta_end = 1e-4, 2e-2

    key = jax.random.PRNGKey(0)
    k_img, k_t, k_eps, k_w, k_b, k_temb = jax.random.split(key, 6)

    images = jax.random.uniform(k_img, (B, C, H, W), jnp.float32)  # [0,1] imgs
    t = jax.random.randint(k_t, (B,), 1, noise_steps)              # timesteps
    eps = jax.random.normal(k_eps, (B, C, H, W), jnp.float32)      # randn_like

    # diffusion schedule (torch.linspace + cumprod)
    beta = jnp.linspace(beta_start, beta_end, noise_steps, dtype=jnp.float32)
    alpha = 1.0 - beta
    alpha_hat = jnp.cumprod(alpha)

    # deterministic surrogate-model parameters
    w = jax.random.normal(k_w, (C, C), jnp.float32) * 0.3           # 1x1 conv
    bias = jax.random.normal(k_b, (C, 1), jnp.float32) * 0.1
    temb = jax.random.normal(k_temb, (C, B), jnp.float32) * 0.1     # time emb

    # --- run kernel ----------------------------------------------------------
    fwd = jax.jit(gaussian_diffusion_forward)
    loss = jax.block_until_ready(fwd(images, t, eps, alpha_hat, w, bias, temb))

    ref = jax.block_until_ready(
        _reference_forward(images, t, eps, alpha_hat, w, bias, temb))

    assert np.allclose(np.asarray(loss), np.asarray(ref),
                       rtol=1e-4, atol=1e-5), (loss, ref)
    print("KERNEL_OK")
</pallas_src>

<mosaic_0001>
module attributes {stable_mosaic.version = 11 : i64} {
  func.func @_diffusion_mse_kernel(%arg0: i32, %arg1: memref<8x256xf32, #tpu.memory_space<vmem>>, %arg2: memref<8x256xf32, #tpu.memory_space<vmem>>, %arg3: memref<8x1xf32, #tpu.memory_space<vmem>>, %arg4: memref<8x1xf32, #tpu.memory_space<vmem>>, %arg5: memref<8x1xf32, #tpu.memory_space<vmem>>, %arg6: memref<8x8xf32, #tpu.memory_space<vmem>>, %arg7: memref<1x1x256xf32, #tpu.memory_space<vmem>>) attributes {dimension_semantics = [#tpu.dimension_semantics<parallel>], iteration_bounds = array<i64: 1>, scalar_prefetch = 0 : i64, scratch_operands = 0 : i64, tpu.core_type = #tpu.core_type<tc>, window_params = [{transform_indices = @transform_0, window_bounds = array<i64: 8, 256>}, {transform_indices = @transform_1, window_bounds = array<i64: 8, 256>}, {transform_indices = @transform_2, window_bounds = array<i64: 8, 1>}, {transform_indices = @transform_3, window_bounds = array<i64: 8, 1>}, {transform_indices = @transform_4, window_bounds = array<i64: 8, 1>}, {pipeline_mode = #tpu.pipeline_mode<synchronous>, transform_indices = @transform_5, window_bounds = array<i64: 8, 8>}, {transform_indices = @transform_6, window_bounds = array<i64: 1, 1, 256>}]} {
    %c0 = arith.constant 0 : index
    %c0_0 = arith.constant 0 : index
    %0 = vector.load %arg1[%c0, %c0_0] : memref<8x256xf32, #tpu.memory_space<vmem>>, vector<8x256xf32>
    %c0_1 = arith.constant 0 : index
    %c0_2 = arith.constant 0 : index
    %1 = vector.load %arg2[%c0_1, %c0_2] : memref<8x256xf32, #tpu.memory_space<vmem>>, vector<8x256xf32>
    %c0_3 = arith.constant 0 : index
    %c0_4 = arith.constant 0 : index
    %2 = vector.load %arg3[%c0_3, %c0_4] : memref<8x1xf32, #tpu.memory_space<vmem>>, vector<8x1xf32>
    %3 = vector.broadcast %2 : vector<8x1xf32> to vector<8x256xf32>
    %4 = arith.mulf %3, %0 : vector<8x256xf32>
    %c0_5 = arith.constant 0 : index
    %c0_6 = arith.constant 0 : index
    %5 = vector.load %arg4[%c0_5, %c0_6] : memref<8x1xf32, #tpu.memory_space<vmem>>, vector<8x1xf32>
    %6 = vector.broadcast %5 : vector<8x1xf32> to vector<8x256xf32>
    %7 = arith.mulf %6, %1 : vector<8x256xf32>
    %8 = arith.addf %4, %7 : vector<8x256xf32>
    %c0_7 = arith.constant 0 : index
    %c0_8 = arith.constant 0 : index
    %9 = vector.load %arg6[%c0_7, %c0_8] : memref<8x8xf32, #tpu.memory_space<vmem>>, vector<8x8xf32>
    %cst = arith.constant dense<0.000000e+00> : vector<8x256xf32>
    %10 = tpu.matmul %9, %8, %cst {dimension_numbers = #tpu.dot_dimension_numbers<[1], [0], [0], [1], [0, 0, 1, 1], [], []>} : vector<8x8xf32>, vector<8x256xf32>, vector<8x256xf32> -> vector<8x256xf32>
    %c0_9 = arith.constant 0 : index
    %c0_10 = arith.constant 0 : index
    %11 = vector.load %arg5[%c0_9, %c0_10] : memref<8x1xf32, #tpu.memory_space<vmem>>, vector<8x1xf32>
    %12 = vector.broadcast %11 : vector<8x1xf32> to vector<8x256xf32>
    %13 = arith.addf %10, %12 : vector<8x256xf32>
    %14 = arith.subf %1, %13 : vector<8x256xf32>
    %15 = arith.mulf %14, %14 : vector<8x256xf32>
    %cst_11 = arith.constant dense<0.000000e+00> : vector<256xf32>
    %16 = vector.multi_reduction <add>, %15, %cst_11 [0] : vector<8x256xf32> to vector<256xf32>
    %17 = vector.shape_cast %16 : vector<256xf32> to vector<1x256xf32>
    %c0_12 = arith.constant 0 : index
    %c0_13 = arith.constant 0 : index
    %c0_14 = arith.constant 0 : index
    %18 = vector.load %arg7[%c0_12, %c0_13, %c0_14] : memref<1x1x256xf32, #tpu.memory_space<vmem>>, vector<1x1x256xf32>
    %19 = vector.shape_cast %18 : vector<1x1x256xf32> to vector<1x256xf32>
    %20 = vector.shape_cast %17 : vector<1x256xf32> to vector<1x1x256xf32>
    tpu.vector_store %arg7[%c0_12, %c0_13, %c0_14], %20 {strides = array<i32>} : memref<1x1x256xf32, #tpu.memory_space<vmem>>, vector<1x1x256xf32>,
    return
  }
  func.func @transform_0(%arg0: i32) -> (i32, i32) {
    %c0_i32 = arith.constant 0 : i32
    %c0_i32_0 = arith.constant 0 : i32
    return %arg0, %c0_i32 : i32, i32
  }
  func.func @transform_1(%arg0: i32) -> (i32, i32) {
    %c0_i32 = arith.constant 0 : i32
    %c0_i32_0 = arith.constant 0 : i32
    return %arg0, %c0_i32 : i32, i32
  }
  func.func @transform_2(%arg0: i32) -> (i32, i32) {
    %c0_i32 = arith.constant 0 : i32
    %c0_i32_0 = arith.constant 0 : i32
    return %arg0, %c0_i32 : i32, i32
  }
  func.func @transform_3(%arg0: i32) -> (i32, i32) {
    %c0_i32 = arith.constant 0 : i32
    %c0_i32_0 = arith.constant 0 : i32
    return %arg0, %c0_i32 : i32, i32
  }
  func.func @transform_4(%arg0: i32) -> (i32, i32) {
    %c0_i32 = arith.constant 0 : i32
    %c0_i32_0 = arith.constant 0 : i32
    return %arg0, %c0_i32 : i32, i32
  }
  func.func @transform_5(%arg0: i32) -> (i32, i32) {
    %c0_i32 = arith.constant 0 : i32
    %c0_i32_0 = arith.constant 0 : i32
    %c0_i32_1 = arith.constant 0 : i32
    return %c0_i32, %c0_i32_0 : i32, i32
  }
  func.func @transform_6(%arg0: i32) -> (i32, i32, i32) {
    %c0_i32 = arith.constant 0 : i32
    %c0_i32_0 = arith.constant 0 : i32
    %c0_i32_1 = arith.constant 0 : i32
    return %arg0, %c0_i32, %c0_i32_0 : i32, i32, i32
  }
}

</mosaic_0001>

<bundles_post_ra>
// kernel: gaussian_diffusion_forward.1
= control target key start
LH: loop header
LB: loop body
LE: loop exit
PB: predicated region body
PF: predicated region fallthrough
CT: control target
= control target key end

     0   :  { %v176_v0 = vmov 0   ;;  %v177_v3 = vmov 0.0   ;;  %vm52_vm0 = vcmask 64512   ;;  %v178_v32 = vmov 1966171168   ;;  %s241_s2 = inlined_call_operand.vmem [shape: f32[8,1], index: 2, kind: input, shape index: {}]   ;;  %s242_s3 = inlined_call_operand.vmem [shape: f32[8,1], index: 3, kind: input, shape index: {}]   ;;  %s243_s4 = inlined_call_operand.vmem [shape: f32[8,1], index: 4, kind: input, shape index: {}]   ;;  %s244_s0 = inlined_call_operand.vmem [shape: f32[8,256], index: 0, kind: input, shape index: {}]   ;;  %s245_s1 = inlined_call_operand.vmem [shape: f32[8,256], index: 1, kind: input, shape index: {}]   ;;  %s246_s5 = inlined_call_operand.vmem [shape: f32[8,8], index: 5, kind: input, shape index: {}]   ;;  %s247_s6 = inlined_call_operand.vmem [shape: f32[1,1,256], index: 6, kind: output, shape index: {}]  }
   0x1   :  { %174 = vset.pattern.permute.xlu0 %v176_v0  ;;  %v27_v1 = vld [vmem:[%s241_s2] sm:$0xff]  ;;  %175 = vset.pattern.permute.xlu1 %v176_v0  ;;  %v24_v7 = vld [vmem:[%s244_s0 + $0x8] sm:$0xff]  ;;  %v147_v33 = vunpack.c.l.s4 %v178_v32  ;;  %v149_v34 = vlaneseq }
   0x2   :  { %30 = vperm.xlu0 %174, %v27_v1   ;;  %v35_v2 = vld [vmem:[%s242_s3] sm:$0xff]  ;;  %120 = vmatprep.mubr.f32.mxu0 %v177_v3  ;;  %v26_v9 = vld [vmem:[%s245_s1 + $0x8] sm:$0xff] }
   0x3   :  { %v46_v4 = vld [vmem:[%s243_s4] sm:$0xff]  ;;  %v148_v39 = vunpack.c.0.s8 %v147_v33  ;;  %v150_v40 = vshrl.u32 %v149_v34, 7  ;;  %vm163_vm1 = vcmp.lt.s32.totalorder %v149_v34, 256 }
   0x4   :  { %49 = vperm.xlu1 %175, %v46_v4   ;;  %v23_v6 = vld [vmem:[%s244_s0] sm:$0xff] }
   0x5   :  { %v25_v8 = vld [vmem:[%s245_s1] sm:$0xff]  ;;  %v151_v44 = vsub.s32 %v148_v39, %v150_v40 }
   0x6   :  { %38 = vperm.xlu0 %174, %v35_v2   ;;  %v45_v17 = vld [vmem:[%s246_s5] sm:$0xff] }
  0x7d   :  { %v31_v5 = vpop.permute.xlu0 %30 }
  0x7e   :  { %v33_v11 = vmul.f32 %v31_v5, %v23_v6  ;;  %v34_v12 = vmul.f32 %v31_v5, %v24_v7 }
  0x7f   :  { %v50_v18 = vpop.permute.xlu1 %49 }
  0x81   :  { %v39_v10 = vpop.permute.xlu0 %38 }
  0x82   :  { %v41_v13 = vmul.f32 %v39_v10, %v25_v8  ;;  %v42_v14 = vmul.f32 %v39_v10, %v26_v9 }
  0x84   :  { %v44_v15 = vadd.f32 %v42_v14, %v34_v12  ;;  %v43_v16 = vadd.f32 %v41_v13, %v33_v11 }
  0x86   :  { %86 = vmatprep.subr.mxu0 %v44_v15 }
  0x87   :  { %87 = vmatpush1.msra.mxu0 %v43_v16 }
  0x88   :  { %170 = vmatmul.mubr.msk.f32.vlgmr.msra.gmra.mxu0 %vm52_vm0, %v45_v17 }
 0x148   :  { %v122_v19 = vpop.f32.mrf.mxu0 }
 0x149   :  { %v123_v20 = vadd.f32 %v122_v19, %v50_v18 }
 0x14a   :  { %v124_v21 = vpop.f32.mrf.mxu0 }
 0x14b   :  { %v127_v22 = vsub.f32 %v25_v8, %v123_v20  ;;  %v125_v23 = vadd.f32 %v124_v21, %v50_v18 }
 0x14d   :  { %v129_v24 = vmul.f32 %v127_v22, %v127_v22  ;;  %v128_v25 = vsub.f32 %v26_v9, %v125_v23 }
 0x14f   :  { %v131_v26 = vrot.slane %v129_v24, 4  ;;  %v130_v27 = vmul.f32 %v128_v25, %v128_v25 }
 0x151   :  { %v132_v28 = vadd.f32 %v131_v26, %v129_v24  ;;  %v137_v29 = vrot.slane %v130_v27, 4 }
 0x153   :  { %v133_v30 = vrot.slane %v132_v28, 2  ;;  %v138_v31 = vadd.f32 %v137_v29, %v130_v27 }
 0x155   :  { %v134_v35 = vadd.f32 %v133_v30, %v132_v28  ;;  %v139_v36 = vrot.slane %v138_v31, 2 }
 0x157   :  { %v135_v37 = vrot.slane %v134_v35, 1  ;;  %v140_v38 = vadd.f32 %v139_v36, %v138_v31 }
 0x159   :  { %v141_v41 = vrot.slane %v140_v38, 1  ;;  %v136_v42 = vadd.f32 %v135_v37, %v134_v35 }
 0x15b   :  { %v142_v43 = vadd.f32 %v141_v41, %v140_v38 }
 0x15d   :  { %v145_v45 = vcombine.low %v136_v42, %v142_v43 }
 0x15f   :  { %v152_v46 = vrot.slane %v145_v45, %v151_v44 }
 0x161   :  { %v159_v47 = vrot.slane %v152_v46, %v151_v44 }
 0x163   :  { %165 = vst.msk [vmem:[%s247_s6] sm:$0x3] %vm163_vm1, %v159_v47 }

</bundles_post_ra>
